<compile_context>
chip_gen: v7x
topology: tpu7x:2x2x1
jax: 0.10.0
libtpu: 0.0.40
codegen_flags: <defaults>
</compile_context>

<pallas_src>
import numpy as np
import jax
import jax.numpy as jnp
from jax.experimental import pallas as pl
from jax.experimental.pallas import tpu as pltpu

EPS = 1e-4
TEMP = 0.1
INV_TEMP = 1.0 / TEMP


def _round_up(a, b):
    return ((a + b - 1) // b) * b


def _sigmoid(v):
    # Exact formulation (1 EUP exp + divide); used identically in the kernel
    # and the matched reference so their elementwise paths agree bit-for-bit.
    return 1.0 / (1.0 + jnp.exp(-v))


# --------------------------------------------------------------------------
# Kernel 1: concrete-dropout mask + h = x' @ W (written to HBM as bf16).
# --------------------------------------------------------------------------
def _mask_xw_kernel(p_logit_ref, x_ref, noise_ref, w_ref, h_ref):
    # Scalar dropout parameters (computed once per grid step; cheap).
    p = _sigmoid(p_logit_ref[0])
    logit_p = jnp.log(p + EPS) - jnp.log(1.0 - p + EPS)
    inv_retain = 1.0 / (1.0 - p)

    # Concrete-dropout mask, exact f32 elementwise math.
    u = noise_ref[...]
    logit_u = jnp.log(u + EPS) - jnp.log(1.0 - u + EPS)
    drop_prob = _sigmoid((logit_p + logit_u) * INV_TEMP)
    mask = (1.0 - drop_prob) * inv_retain            # (1 - dp) / (1 - p)
    x_dropped = (x_ref[...] * mask).astype(jnp.bfloat16)

    # x' @ W on the MXU: bf16 inputs, f32 accumulation, bf16 output.
    h = jnp.dot(x_dropped, w_ref[...], preferred_element_type=jnp.float32)
    h_ref[...] = h.astype(jnp.bfloat16)


# --------------------------------------------------------------------------
# Kernel 2: out = adj @ h + b, row-tiled ("parallel") and K-tiled ("arbitrary")
# with a persistent f32 accumulator.
# --------------------------------------------------------------------------
def _adj_matmul_kernel(adj_ref, h_ref, b_ref, out_ref, acc_ref):
    k = pl.program_id(1)

    @pl.when(k == 0)
    def _():
        acc_ref[...] = jnp.zeros_like(acc_ref)

    acc_ref[...] += jnp.dot(adj_ref[...], h_ref[...],
                            preferred_element_type=jnp.float32)

    @pl.when(k == pl.num_programs(1) - 1)
    def _():
        out_ref[...] = acc_ref[...] + b_ref[...]


def _vmem_limit(tile_bytes):
    # tile_bytes already includes double-buffering; add headroom, clamp to a
    # value that is safe on every generation (v7x physical VMEM = 64 MiB/TC).
    return int(min(max(2 * tile_bytes, 16 << 20) + (2 << 20), 64 << 20))


def gnn_concrete_dropout_forward(p_logit, x, noise, adj, w, b, *,
                                 row_tile=256, k_tile=512):
    N, F = x.shape
    H = w.shape[1]

    # ---- padded, lane-dense shapes -----------------------------------------
    Fp = _round_up(F, 128)                       # x / noise / W-rows lane pad
    Hp = _round_up(H, 128)                       # output feature lane pad
    tk = min(k_tile, _round_up(N, 128))          # K tile (adj cols, h/x rows)
    tm = min(row_tile, _round_up(N, 8))          # row tile (adj/out rows)
    Nk = _round_up(N, tk)
    Nm = _round_up(N, tm)

    x_p = jnp.pad(x.astype(jnp.float32), ((0, Nk - N), (0, Fp - F)))
    u_p = jnp.pad(noise.astype(jnp.float32), ((0, Nk - N), (0, Fp - F)))
    w_p = jnp.pad(w, ((0, Fp - F), (0, Hp - H))).astype(jnp.bfloat16)
    b_p = jnp.pad(b, (0, Hp - H)).reshape(1, Hp).astype(jnp.float32)
    adj_p = jnp.pad(adj, ((0, Nm - N), (0, Nk - N))).astype(jnp.bfloat16)

    # ---- kernel 1: h = concrete_dropout(x) @ W -----------------------------
    k1_bytes = (2 * tk * Fp * 4 * 2              # x + noise tiles (f32, 2-buf)
                + Fp * Hp * 2 * 2                # W (bf16)
                + tk * Hp * 2 * 2)               # h output tile (bf16, 2-buf)
    cost1 = pl.CostEstimate(
        flops=2 * Nk * Fp * Hp,
        transcendentals=4 * Nk * Fp,             # 2 logs + exp + divide
        bytes_accessed=2 * Nk * Fp * 4 + Fp * Hp * 2 + Nk * Hp * 2)

    h = pl.pallas_call(
        _mask_xw_kernel,
        out_shape=jax.ShapeDtypeStruct((Nk, Hp), jnp.bfloat16),
        grid=(Nk // tk,),
        in_specs=[
            pl.BlockSpec(memory_space=pltpu.MemorySpace.SMEM),   # p_logit (1,)
            pl.BlockSpec((tk, Fp), lambda i: (i, 0)),            # x row tile
            pl.BlockSpec((tk, Fp), lambda i: (i, 0)),            # noise tile
            pl.BlockSpec((Fp, Hp), lambda i: (0, 0)),            # W (DMA once)
        ],
        out_specs=pl.BlockSpec((tk, Hp), lambda i: (i, 0)),
        compiler_params=pltpu.CompilerParams(
            dimension_semantics=("parallel",),
            vmem_limit_bytes=_vmem_limit(k1_bytes)),
        cost_estimate=cost1,
    )(p_logit, x_p, u_p, w_p)

    # ---- kernel 2: out = adj @ h + b ---------------------------------------
    k2_bytes = (tm * tk * 2 * 2                  # adj tile (bf16, 2-buf)
                + tk * Hp * 2 * 2                # h K-slab (bf16, 2-buf)
                + Hp * 4 * 2                     # bias
                + tm * Hp * 4 * 2                # out tile (f32, 2-buf)
                + tm * Hp * 4)                   # accumulator scratch
    cost2 = pl.CostEstimate(
        flops=2 * Nm * Nk * Hp,
        transcendentals=0,
        bytes_accessed=(Nm * Nk * 2                      # adj stream (bf16)
                        + (Nm // tm) * Nk * Hp * 2       # h re-read per row tile
                        + Nm * Hp * 4 + Hp * 4))

    out = pl.pallas_call(
        _adj_matmul_kernel,
        out_shape=jax.ShapeDtypeStruct((Nm, Hp), jnp.float32),
        grid=(Nm // tm, Nk // tk),
        in_specs=[
            pl.BlockSpec((tm, tk), lambda i, k: (i, k)),   # adj tile
            pl.BlockSpec((tk, Hp), lambda i, k: (k, 0)),   # h K-slab
            pl.BlockSpec((1, Hp), lambda i, k: (0, 0)),    # bias
        ],
        out_specs=pl.BlockSpec((tm, Hp), lambda i, k: (i, 0)),
        scratch_shapes=[pltpu.VMEM((tm, Hp), jnp.float32)],
        compiler_params=pltpu.CompilerParams(
            dimension_semantics=("parallel", "arbitrary"),
            vmem_limit_bytes=_vmem_limit(k2_bytes)),
        cost_estimate=cost2,
    )(adj_p, h, b_p)

    return out[:N, :H]


# --------------------------------------------------------------------------
# References
# --------------------------------------------------------------------------
def _reference_bf16(p_logit, x, noise, adj, w, b):
    """Pure-JAX reference mirroring the kernel's bf16-MXU precision exactly."""
    p = _sigmoid(p_logit[0])
    logit_p = jnp.log(p + EPS) - jnp.log(1.0 - p + EPS)
    logit_u = jnp.log(noise + EPS) - jnp.log(1.0 - noise + EPS)
    dp = _sigmoid((logit_p + logit_u) * INV_TEMP)
    inv_retain = 1.0 / (1.0 - p)
    mask = (1.0 - dp) * inv_retain
    xd = (x * mask).astype(jnp.bfloat16)
    h = jnp.dot(xd, w.astype(jnp.bfloat16), preferred_element_type=jnp.float32)
    out = jnp.dot(adj.astype(jnp.bfloat16), h.astype(jnp.bfloat16),
                  preferred_element_type=jnp.float32)
    return out + b[None, :]


def _reference_f32(p_logit, x, noise, adj, w, b):
    """Full-precision reference of the true PyTorch forward semantics."""
    p = jax.nn.sigmoid(p_logit[0])
    dl = (jnp.log(p + EPS) - jnp.log(1.0 - p + EPS)
          + jnp.log(noise + EPS) - jnp.log(1.0 - noise + EPS))
    dp = jax.nn.sigmoid(dl / TEMP)
    xd = x * (1.0 - dp) / (1.0 - p)
    return adj @ (xd @ w) + b[None, :]


if __name__ == "__main__":
    N, F, H = 128, 64, 32

    # p_logit init: Uniform(logit(0.3), logit(0.3)) == the constant logit(0.3)
    p_logit = jnp.array([np.log(0.3) - np.log(1.0 - 0.3)], dtype=jnp.float32)

    key = jax.random.PRNGKey(0)
    kx, kn, ka, kw, kb = jax.random.split(key, 5)
    x = jax.random.normal(kx, (N, F), dtype=jnp.float32)
    noise = jax.random.uniform(kn, (N, F), dtype=jnp.float32)      # unif_noise
    adj = (jax.random.uniform(ka, (N, N)) < 0.1).astype(jnp.float32)
    adj = adj + jnp.eye(N, dtype=jnp.float32)                      # self loops
    w = jax.random.normal(kw, (F, H), dtype=jnp.float32) * 0.1     # layer weight
    b = jax.random.normal(kb, (H,), dtype=jnp.float32) * 0.01      # layer bias

    # NOTE: the PyTorch forward also computes weight/dropout regularizers but
    # returns only `out`, so they are intentionally not part of the kernel.

    out = gnn_concrete_dropout_forward(p_logit, x, noise, adj, w, b)
    out = jax.block_until_ready(out)

    # Primary check: same bf16-MXU precision model, exact elementwise math.
    ref_bf16 = _reference_bf16(p_logit, x, noise, adj, w, b)
    np.testing.assert_allclose(np.asarray(out), np.asarray(ref_bf16),
                               rtol=2e-2, atol=2e-2)

    # Secondary check vs. the true f32 semantics; looser tolerance covers the
    # bf16 matmul inputs (adj is exact in bf16, h/x' carry ~2^-9 rel error).
    ref_f32 = _reference_f32(p_logit, x, noise, adj, w, b)
    np.testing.assert_allclose(np.asarray(out), np.asarray(ref_f32),
                               rtol=1e-1, atol=2e-1)

    print("KERNEL_OK")
</pallas_src>

<mosaic_0001>
module attributes {stable_mosaic.version = 11 : i64} {
  func.func @_mask_xw_kernel(%arg0: i32, %arg1: memref<1xf32, #tpu.memory_space<smem>>, %arg2: memref<128x128xf32, #tpu.memory_space<vmem>>, %arg3: memref<128x128xf32, #tpu.memory_space<vmem>>, %arg4: memref<128x128xbf16, #tpu.memory_space<vmem>>, %arg5: memref<128x128xbf16, #tpu.memory_space<vmem>>) attributes {dimension_semantics = [#tpu.dimension_semantics<parallel>], iteration_bounds = array<i64: 1>, scalar_prefetch = 0 : i64, scratch_operands = 0 : i64, tpu.core_type = #tpu.core_type<tc>, window_params = [{transform_indices = @transform_0, window_bounds = array<i64: 1>}, {transform_indices = @transform_1, window_bounds = array<i64: 128, 128>}, {transform_indices = @transform_2, window_bounds = array<i64: 128, 128>}, {pipeline_mode = #tpu.pipeline_mode<synchronous>, transform_indices = @transform_3, window_bounds = array<i64: 128, 128>}, {transform_indices = @transform_4, window_bounds = array<i64: 128, 128>}]} {
    %c0 = arith.constant 0 : index
    %0 = memref.load %arg1[%c0] : memref<1xf32, #tpu.memory_space<smem>>
    %cst = arith.constant 0.000000e+00 : f32
    %1 = arith.subf %cst, %0 : f32
    %2 = math.exp %1 : f32
    %cst_0 = arith.constant 1.000000e+00 : f32
    %3 = arith.addf %cst_0, %2 : f32
    %cst_1 = arith.constant 1.000000e+00 : f32
    %4 = arith.divf %cst_1, %3 : f32
    %cst_2 = arith.constant 9.99999974E-5 : f32
    %5 = arith.addf %4, %cst_2 : f32
    %6 = math.log %5 : f32
    %cst_3 = arith.constant 1.000000e+00 : f32
    %7 = arith.subf %cst_3, %4 : f32
    %cst_4 = arith.constant 9.99999974E-5 : f32
    %8 = arith.addf %7, %cst_4 : f32
    %9 = math.log %8 : f32
    %10 = arith.subf %6, %9 : f32
    %cst_5 = arith.constant 1.000000e+00 : f32
    %11 = arith.subf %cst_5, %4 : f32
    %cst_6 = arith.constant 1.000000e+00 : f32
    %12 = arith.divf %cst_6, %11 : f32
    %c0_7 = arith.constant 0 : index
    %c0_8 = arith.constant 0 : index
    %13 = vector.load %arg3[%c0_7, %c0_8] : memref<128x128xf32, #tpu.memory_space<vmem>>, vector<128x128xf32>
    %cst_9 = arith.constant 9.99999974E-5 : f32
    %14 = vector.broadcast %cst_9 : f32 to vector<128x128xf32>
    %15 = arith.addf %13, %14 : vector<128x128xf32>
    %16 = math.log %15 : vector<128x128xf32>
    %cst_10 = arith.constant 1.000000e+00 : f32
    %17 = vector.broadcast %cst_10 : f32 to vector<128x128xf32>
    %18 = arith.subf %17, %13 : vector<128x128xf32>
    %cst_11 = arith.constant 9.99999974E-5 : f32
    %19 = vector.broadcast %cst_11 : f32 to vector<128x128xf32>
    %20 = arith.addf %18, %19 : vector<128x128xf32>
    %21 = math.log %20 : vector<128x128xf32>
    %22 = arith.subf %16, %21 : vector<128x128xf32>
    %23 = vector.broadcast %10 : f32 to vector<128x128xf32>
    %24 = arith.addf %23, %22 : vector<128x128xf32>
    %cst_12 = arith.constant 1.000000e+01 : f32
    %25 = vector.broadcast %cst_12 : f32 to vector<128x128xf32>
    %26 = arith.mulf %24, %25 : vector<128x128xf32>
    %cst_13 = arith.constant 0.000000e+00 : f32
    %27 = vector.broadcast %cst_13 : f32 to vector<128x128xf32>
    %28 = arith.subf %27, %26 : vector<128x128xf32>
    %29 = math.exp %28 : vector<128x128xf32>
    %cst_14 = arith.constant 1.000000e+00 : f32
    %30 = vector.broadcast %cst_14 : f32 to vector<128x128xf32>
    %31 = arith.addf %30, %29 : vector<128x128xf32>
    %cst_15 = arith.constant 1.000000e+00 : f32
    %32 = vector.broadcast %cst_15 : f32 to vector<128x128xf32>
    %33 = arith.divf %32, %31 : vector<128x128xf32>
    %cst_16 = arith.constant 1.000000e+00 : f32
    %34 = vector.broadcast %cst_16 : f32 to vector<128x128xf32>
    %35 = arith.subf %34, %33 : vector<128x128xf32>
    %36 = vector.broadcast %12 : f32 to vector<128x128xf32>
    %37 = arith.mulf %35, %36 : vector<128x128xf32>
    %c0_17 = arith.constant 0 : index
    %c0_18 = arith.constant 0 : index
    %38 = vector.load %arg2[%c0_17, %c0_18] : memref<128x128xf32, #tpu.memory_space<vmem>>, vector<128x128xf32>
    %39 = arith.mulf %38, %37 : vector<128x128xf32>
    %40 = arith.truncf %39 : vector<128x128xf32> to vector<128x128xbf16>
    %c0_19 = arith.constant 0 : index
    %c0_20 = arith.constant 0 : index
    %41 = vector.load %arg4[%c0_19, %c0_20] : memref<128x128xbf16, #tpu.memory_space<vmem>>, vector<128x128xbf16>
    %cst_21 = arith.constant dense<0.000000e+00> : vector<128x128xf32>
    %42 = tpu.matmul %40, %41, %cst_21 {dimension_numbers = #tpu.dot_dimension_numbers<[1], [0], [0], [1], [0, 0, 1, 1], [], []>} : vector<128x128xbf16>, vector<128x128xbf16>, vector<128x128xf32> -> vector<128x128xf32>
    %43 = arith.truncf %42 : vector<128x128xf32> to vector<128x128xbf16>
    %c0_22 = arith.constant 0 : index
    %c0_23 = arith.constant 0 : index
    %44 = vector.load %arg5[%c0_22, %c0_23] : memref<128x128xbf16, #tpu.memory_space<vmem>>, vector<128x128xbf16>
    tpu.vector_store %arg5[%c0_22, %c0_23], %43 {strides = array<i32>} : memref<128x128xbf16, #tpu.memory_space<vmem>>, vector<128x128xbf16>,
    return
  }
  func.func @transform_0(%arg0: i32) -> i32 {
    %c0_i32 = arith.constant 0 : i32
    %c0_i32_0 = arith.constant 0 : i32
    return %c0_i32 : i32
  }
  func.func @transform_1(%arg0: i32) -> (i32, i32) {
    %c0_i32 = arith.constant 0 : i32
    %c0_i32_0 = arith.constant 0 : i32
    return %arg0, %c0_i32 : i32, i32
  }
  func.func @transform_2(%arg0: i32) -> (i32, i32) {
    %c0_i32 = arith.constant 0 : i32
    %c0_i32_0 = arith.constant 0 : i32
    return %arg0, %c0_i32 : i32, i32
  }
  func.func @transform_3(%arg0: i32) -> (i32, i32) {
    %c0_i32 = arith.constant 0 : i32
    %c0_i32_0 = arith.constant 0 : i32
    %c0_i32_1 = arith.constant 0 : i32
    return %c0_i32, %c0_i32_0 : i32, i32
  }
  func.func @transform_4(%arg0: i32) -> (i32, i32) {
    %c0_i32 = arith.constant 0 : i32
    %c0_i32_0 = arith.constant 0 : i32
    return %arg0, %c0_i32 : i32, i32
  }
}

</mosaic_0001>

<bundles_post_ra>
// kernel: tpu_custom_call.1
= control target key start
LH: loop header
LB: loop body
LE: loop exit
PB: predicated region body
PF: predicated region fallthrough
CT: control target
= control target key end

     0   :  { %10 = vsyncpa [#allocation4], 0  ;;  %s1290_s0 = inlined_call_operand.<no memory space> [shape: f32[1], index: 0, kind: input, shape index: {}]   ;;  %s1291_s1 = inlined_call_operand.hbm [shape: f32[128,128], index: 1, kind: input, shape index: {}]   ;;  %s1292_s2 = inlined_call_operand.hbm [shape: f32[128,128], index: 2, kind: input, shape index: {}]   ;;  %s1293_s3 = inlined_call_operand.hbm [shape: bf16[128,128], index: 3, kind: input, shape index: {}]   ;;  %s1294_s4 = inlined_call_operand.hbm [shape: bf16[128,128], index: 4, kind: output, shape index: {}]  }
   0x1   :  { %11 = vsyncpa [#allocation7], 0 }
   0x2   :  { %12 = vsyncpa [#allocation5], 0  ;;  %s1100_s15 = smov [#allocation6]   ;;  %s1101_s17 = smov [#allocation3]  }
   0x3   :  { %s32_s16 = sshll.u32 %s1100_s15, 4  ;;  %s20_s18 = sshll.u32 %s1101_s17, 4  ;;  %s33_s16 = int_to_ptr.vmem [resolvable:$true] %s32_s16  ;;  %s1133_s18 = int_to_ptr.vmem [resolvable:$true] %s20_s18 }
   0x4   :  { %s1006_s21 = scalar_lea.hbm %s1292_s2, 2048 }
   0x5   :  { %p1007_p0 = scmp.ne.s32.totalorder %s1292_s2, %s1006_s21  ;;  %p1010_p1 = scmp.lt.u32.totalorder %s1006_s21, %s1292_s2 }
   0x7   :  { %p1012_p2 = pnand %p1010_p1, %p1007_p0 }
   0x9   :  { %1015 = shalt.err (!%p1012_p2)
}
   0xa   :  { %s1016_s26 = scalar_lea.vmem %s33_s16, 2048  ;;  %p1021_p4 = scmp.lt.s32.totalorder %s33_s16, %s33_s16 }
   0xb   :  { %p1017_p3 = scmp.ne.s32.totalorder %s33_s16, %s1016_s26  ;;  %p1022_p5 = scmp.lt.s32.totalorder %s1016_s26, %s1016_s26 }
   0xd   :  { %p1023_p6 = por %p1022_p5, %p1021_p4 }
   0xf   :  { %p1024_p7 = pnand %p1023_p6, %p1017_p3 }
  0x11   :  { %1027 = shalt.err (!%p1024_p7)
}
  0x12   :  { %s1102_s27 = smov 128   ;;  %s1103_s28 = smov 8  }
  0x13   :  { %38 = dma.hbm_to_vmem [thread:$0]  %s1292_s2, 2048, %s33_s16, [#allocation7], %s1102_s27, %s1102_s27, %s1103_s28  }
  0x14   :  { %s1028_s7 = scalar_lea.hbm %s1291_s1, 2048 }
  0x15   :  { %p1029_p8 = scmp.ne.s32.totalorder %s1291_s1, %s1028_s7  ;;  %p1032_p9 = scmp.lt.u32.totalorder %s1028_s7, %s1291_s1 }
  0x17   :  { %p1034_p10 = pnand %p1032_p9, %p1029_p8 }
  0x19   :  { %1037 = shalt.err (!%p1034_p10)
}
  0x1a   :  { %s1038_s12 = scalar_lea.vmem %s1133_s18, 2048  ;;  %p1043_p12 = scmp.lt.s32.totalorder %s1133_s18, %s1133_s18 }
  0x1b   :  { %p1039_p11 = scmp.ne.s32.totalorder %s1133_s18, %s1038_s12  ;;  %p1044_p13 = scmp.lt.s32.totalorder %s1038_s12, %s1038_s12 }
  0x1d   :  { %p1045_p0 = por %p1044_p13, %p1043_p12 }
  0x1f   :  { %p1046_p1 = pnand %p1045_p0, %p1039_p11 }
  0x21   :  { %1049 = shalt.err (!%p1046_p1)
}
  0x22   :  { %26 = dma.hbm_to_vmem [thread:$0]  %s1291_s1, 2048, %s1133_s18, [#allocation4], %s1102_s27, %s1102_s27, %s1103_s28  }
  0x23   :  { %s1104_s14 = smov [#allocation8]   ;;  %s1050_s19 = scalar_lea.hbm %s1293_s3, 1024 }
  0x24   :  { %s44_s15 = sshll.u32 %s1104_s14, 4  ;;  %p1051_p2 = scmp.ne.s32.totalorder %s1293_s3, %s1050_s19  ;;  %s45_s15 = int_to_ptr.vmem [resolvable:$true] %s44_s15 }
  0x25   :  { %p1054_p3 = scmp.lt.u32.totalorder %s1050_s19, %s1293_s3 }
  0x27   :  { %p1056_p4 = pnand %p1054_p3, %p1051_p2 }
  0x29   :  { %1059 = shalt.err (!%p1056_p4)
}
  0x2a   :  { %s1060_s24 = scalar_lea.vmem %s45_s15, 1024  ;;  %p1065_p6 = scmp.lt.s32.totalorder %s45_s15, %s45_s15 }
  0x2b   :  { %p1061_p5 = scmp.ne.s32.totalorder %s45_s15, %s1060_s24  ;;  %p1066_p7 = scmp.lt.s32.totalorder %s1060_s24, %s1060_s24 }
  0x2d   :  { %p1067_p8 = por %p1066_p7, %p1065_p6 }
  0x2f   :  { %p1068_p9 = pnand %p1067_p8, %p1061_p5 }
  0x31   :  { %1071 = shalt.err (!%p1068_p9)
}
  0x32   :  { %s1105_s1 = smov 64   ;;  %s1106_s18 = smov 4  }
  0x33   :  { %50 = dma.hbm_to_vmem [thread:$0]  %s1293_s3, 1024, %s45_s15, [#allocation7], %s1105_s1, %s1105_s1, %s1106_s18  }
  0x34   :  { %1094 = dma.done.wait [#allocation4], 2048  }
  0x35   :  { %1095 = vsyncadd [#allocation4], 4294965248  ;;  %s62_s29 = ssub.f32 0.0, %s1290_s0 }
  0x36   :  { %1096 = dma.done.wait [#allocation7], 3072  }
  0x37   :  { %1097 = vsyncadd [#allocation7], 4294964224  ;;  %v63_v0 = vstv %s62_s29  ;;  %v860_v4 = vld [vmem:[#allocation8] sm:$0xff]   ;;  %v861_v5 = vld [vmem:[#allocation8 + $0x8] sm:$0xff]   ;;  %s1107_s12 = smov [#allocation9]  }
  0x38   :  { %v64_v1 = vmul.f32 1.442695, %v63_v0  ;;  %794 = vmatprep.subr.bf16.mxu0 %v860_v4  ;;  %826 = vmatprep.subr.bf16.mxu1 %v860_v4  ;;  %v862_v6 = vld [vmem:[#allocation8 + $0x10] sm:$0xff]   ;;  %v863_v8 = vld [vmem:[#allocation8 + $0x18] sm:$0xff]   ;;  %v864_v9 = vld [vmem:[#allocation8 + $0x20] sm:$0xff]   ;;  %s678_s2 = sshll.u32 %s1107_s12, 4  ;;  %s679_s2 = int_to_ptr.vmem [resolvable:$true] %s678_s2 }
  0x39   :  { %795 = vmatpush3.bf16.msra.mxu0 %v860_v4  ;;  %834 = vmatpush3.bf16.msra.mxu1 %v860_v4  ;;  %v865_v10 = vld [vmem:[#allocation8 + $0x28] sm:$0xff]   ;;  %v866_v11 = vld [vmem:[#allocation8 + $0x30] sm:$0xff]   ;;  %v867_v12 = vld [vmem:[#allocation8 + $0x38] sm:$0xff]   ;;  %s1072_s13 = scalar_lea.vmem %s679_s2, 1024  ;;  %p1077_p11 = scmp.lt.s32.totalorder %s679_s2, %s679_s2 }
  0x3a   :  { %868 = vpow2.f32 %v64_v1  ;;  %796 = vmatprep.subr.bf16.mxu0 %v861_v5  ;;  %827 = vmatprep.subr.bf16.mxu1 %v861_v5  ;;  %v86_v20 = vld [vmem:[#allocation6] sm:$0xff]  ;;  %v87_v22 = vld [vmem:[#allocation6 + $0x8] sm:$0xff]  ;;  %v88_v33 = vld [vmem:[#allocation6 + $0x10] sm:$0xff]  ;;  %p1073_p10 = scmp.ne.s32.totalorder %s679_s2, %s1072_s13  ;;  %p1078_p12 = scmp.lt.s32.totalorder %s1072_s13, %s1072_s13 }
  0x3b   :  { %v150_v23 = vsub.f32 1.0, %v86_v20  ;;  %v151_v24 = vsub.f32 1.0, %v87_v22  ;;  %v94_v25 = vld [vmem:[#allocation6 + $0x40] sm:$0xff]  ;;  %v102_v26 = vadd.f32 0.0001, %v86_v20  ;;  %v95_v27 = vld [vmem:[#allocation6 + $0x48] sm:$0xff] }
  0x3c   :  { %v103_v28 = vadd.f32 0.0001, %v87_v22  ;;  %v158_v30 = vsub.f32 1.0, %v94_v25  ;;  %v159_v32 = vsub.f32 1.0, %v95_v27  ;;  %v110_v34 = vadd.f32 0.0001, %v94_v25  ;;  %p1079_p13 = por %p1078_p12, %p1077_p11 }
  0x3d   :  { %797 = vmatpush3.bf16.msra.mxu0 %v861_v5  ;;  %835 = vmatpush3.bf16.msra.mxu1 %v861_v5  ;;  %v166_v29 = vadd.f32 0.0001, %v150_v23  ;;  %v167_v31 = vadd.f32 0.0001, %v151_v24  ;;  %v89_v35 = vld [vmem:[#allocation6 + $0x18] sm:$0xff]  ;;  %v152_v38 = vsub.f32 1.0, %v88_v33 }
  0x3e   :  { %798 = vmatprep.subr.bf16.mxu0 %v862_v6  ;;  %828 = vmatprep.subr.bf16.mxu1 %v862_v6  ;;  %v111_v36 = vadd.f32 0.0001, %v95_v27  ;;  %v174_v37 = vadd.f32 0.0001, %v158_v30  ;;  %v175_v39 = vadd.f32 0.0001, %v159_v32  ;;  %p1080_p0 = pnand %p1079_p13, %p1073_p10 }
  0x3f   :  { %v153_v40 = vsub.f32 1.0, %v89_v35  ;;  %v96_v41 = vld [vmem:[#allocation6 + $0x50] sm:$0xff]  ;;  %v104_v42 = vadd.f32 0.0001, %v88_v33  ;;  %v97_v43 = vld [vmem:[#allocation6 + $0x58] sm:$0xff]  ;;  %v90_v49 = vld [vmem:[#allocation6 + $0x20] sm:$0xff] }
  0x40   :  { %v105_v44 = vadd.f32 0.0001, %v89_v35  ;;  %v168_v45 = vadd.f32 0.0001, %v152_v38  ;;  %v160_v46 = vsub.f32 1.0, %v96_v41  ;;  %v161_v48 = vsub.f32 1.0, %v97_v43 }
  0x41   :  { %799 = vmatpush3.bf16.msra.mxu0 %v862_v6  ;;  %836 = vmatpush3.bf16.msra.mxu1 %v862_v6  ;;  %v169_v47 = vadd.f32 0.0001, %v153_v40  ;;  %v112_v50 = vadd.f32 0.0001, %v96_v41  ;;  %v91_v51 = vld [vmem:[#allocation6 + $0x28] sm:$0xff]  ;;  %v154_v55 = vsub.f32 1.0, %v90_v49 }
  0x42   :  { %800 = vmatprep.subr.bf16.mxu0 %v863_v8  ;;  %829 = vmatprep.subr.bf16.mxu1 %v863_v8  ;;  %v113_v52 = vadd.f32 0.0001, %v97_v43  ;;  %v176_v54 = vadd.f32 0.0001, %v160_v46  ;;  %v177_v57 = vadd.f32 0.0001, %v161_v48 }
  0x43   :  { %v155_v58 = vsub.f32 1.0, %v91_v51  ;;  %v98_v59 = vld [vmem:[#allocation6 + $0x60] sm:$0xff]  ;;  %v106_v61 = vadd.f32 0.0001, %v90_v49  ;;  %v99_v62 = vld [vmem:[#allocation6 + $0x68] sm:$0xff] }
  0x44   :  { %v869_v2 = vpop.eup %868  ;;  %v107_v0 = vadd.f32 0.0001, %v91_v51  ;;  %v163_v6 = vsub.f32 1.0, %v99_v62 }
  0x45   :  { %842 = vpush %v869_v2  ;;  %801 = vmatpush3.bf16.msra.mxu0 %v863_v8  ;;  %837 = vmatpush3.bf16.msra.mxu1 %v863_v8  ;;  %v170_v2 = vadd.f32 0.0001, %v154_v55  ;;  %v171_v5 = vadd.f32 0.0001, %v155_v58 }
  0x46   :  { %802 = vmatprep.subr.bf16.mxu0 %v864_v9  ;;  %830 = vmatprep.subr.bf16.mxu1 %v864_v9 }
  0x49   :  { %803 = vmatpush3.bf16.msra.mxu0 %v864_v9  ;;  %838 = vmatpush3.bf16.msra.mxu1 %v864_v9  ;;  %v114_v9 = vadd.f32 0.0001, %v98_v59 }
  0x4a   :  { %804 = vmatprep.subr.bf16.mxu0 %v865_v10  ;;  %831 = vmatprep.subr.bf16.mxu1 %v865_v10 }
  0x4d   :  { %805 = vmatpush3.bf16.msra.mxu0 %v865_v10  ;;  %839 = vmatpush3.bf16.msra.mxu1 %v865_v10  ;;  %v93_v10 = vld [vmem:[#allocation6 + $0x38] sm:$0xff] }
  0x4e   :  { %806 = vmatprep.subr.bf16.mxu0 %v866_v11  ;;  %832 = vmatprep.subr.bf16.mxu1 %v866_v11  ;;  %v109_v22 = vadd.f32 0.0001, %v93_v10 }
  0x51   :  { %807 = vmatpush3.bf16.msra.mxu0 %v866_v11  ;;  %840 = vmatpush3.bf16.msra.mxu1 %v866_v11 }
  0x52   :  { %808 = vmatprep.subr.bf16.mxu0 %v867_v12  ;;  %833 = vmatprep.subr.bf16.mxu1 %v867_v12 }
  0x55   :  { %809 = vmatpush3.bf16.msra.mxu0 %v867_v12  ;;  %841 = vmatpush3.bf16.msra.mxu1 %v867_v12  ;;  %v115_v12 = vadd.f32 0.0001, %v99_v62 }
  0x76   :  { %s843_s30 = spop %842 }
  0x77   :  { %s67_s5 = sadd.f32 1.0, %s843_s30 }
  0x79   :  { %v68_v3 = vstv %s67_s5 }
  0x7a   :  { %870 = vrcp.f32 %v68_v3  ;;  %v162_v3 = vsub.f32 1.0, %v98_v59 }
  0x84   :  { %v871_v7 = vpop.eup %870 }
  0x85   :  { %844 = vpush %v871_v7  ;;  %v92_v7 = vld [vmem:[#allocation6 + $0x30] sm:$0xff] }
  0x86   :  { %v108_v20 = vadd.f32 0.0001, %v92_v7 }
  0xb6   :  { %s845_s0 = spop %844 }
  0xb7   :  { %s71_s3 = sadd.f32 0.0001, %s845_s0 }
  0xb8   :  { %s76_s6 = ssub.f32 1.0, %s845_s0 }
  0xb9   :  { %v72_v13 = vstv %s71_s3 }
  0xba   :  { %872 = vlog2.f32 %v72_v13  ;;  %s77_s7 = sadd.f32 0.0001, %s76_s6  ;;  %v83_v15 = vstv %s76_s6 }
  0xbc   :  { %v78_v14 = vstv %s77_s7 }
  0xbd   :  { %874 = vlog2.f32 %v78_v14  ;;  %v178_v14 = vadd.f32 0.0001, %v162_v3 }
  0xbe   :  { %876 = vrcp.f32 %v83_v15  ;;  %v156_v15 = vsub.f32 1.0, %v92_v7 }
  0xbf   :  { %878 = vlog2.f32 %v102_v26 }
  0xc0   :  { %880 = vlog2.f32 %v103_v28  ;;  %v172_v24 = vadd.f32 0.0001, %v156_v15 }
  0xc1   :  { %882 = vlog2.f32 %v166_v29  ;;  %v100_v29 = vld [vmem:[#allocation6 + $0x70] sm:$0xff] }
  0xc2   :  { %884 = vlog2.f32 %v167_v31  ;;  %v101_v31 = vld [vmem:[#allocation6 + $0x78] sm:$0xff]  ;;  %v116_v32 = vadd.f32 0.0001, %v100_v29  ;;  %v164_v40 = vsub.f32 1.0, %v100_v29 }
  0xc3   :  { %886 = vlog2.f32 %v110_v34  ;;  %v117_v34 = vadd.f32 0.0001, %v101_v31 }
  0xc4   :  { %v873_v16 = vpop.eup %872  ;;  %888 = vlog2.f32 %v111_v36 }
  0xc5   :  { %v74_v17 = vmul.f32 0.6931472, %v873_v16  ;;  %890 = vlog2.f32 %v174_v37 }
  0xc6   :  { %892 = vlog2.f32 %v175_v39 }
  0xc7   :  { %v875_v18 = vpop.eup %874  ;;  %846 = vpush %v74_v17  ;;  %894 = vlog2.f32 %v104_v42  ;;  %v179_v17 = vadd.f32 0.0001, %v163_v6 }
  0xc8   :  { %v80_v19 = vmul.f32 0.6931472, %v875_v18  ;;  %v877_v21 = vpop.eup %876  ;;  %896 = vlog2.f32 %v105_v44  ;;  %v157_v18 = vsub.f32 1.0, %v93_v10  ;;  %v165_v44 = vsub.f32 1.0, %v101_v31 }
  0xc9   :  { %v1182_v53 = vpop.eup %878  ;;  %898 = vlog2.f32 %v168_v45 }
  0xca   :  { %848 = vpush %v80_v19  ;;  %v1184_v56 = vpop.eup %880  ;;  %900 = vlog2.f32 %v169_v47  ;;  %v173_v26 = vadd.f32 0.0001, %v157_v18  ;;  %v1187_v38 = vmul.f32 0.6931472, %v1182_v53 }
  0xcb   :  { %850 = vpush %v877_v21  ;;  %v883_v60 = vpop.eup %882  ;;  %902 = vlog2.f32 %v112_v50  ;;  %v1190_v39 = vmul.f32 0.6931472, %v1184_v56  ;;  %v180_v56 = vadd.f32 0.0001, %v164_v40 }
  0xcc   :  { %v885_v63 = vpop.eup %884  ;;  %904 = vlog2.f32 %v113_v52  ;;  %v183_v42 = vmul.f32 0.6931472, %v883_v60 }
  0xcd   :  { %v887_v1 = vpop.eup %886  ;;  %906 = vlog2.f32 %v176_v54  ;;  %v185_v43 = vmul.f32 0.6931472, %v885_v63 }
  0xce   :  { %v889_v4 = vpop.eup %888  ;;  %908 = vlog2.f32 %v177_v57  ;;  %v135_v46 = vmul.f32 0.6931472, %v887_v1 }
  0xcf   :  { %v891_v8 = vpop.eup %890  ;;  %910 = vlog2.f32 %v106_v61  ;;  %v137_v47 = vmul.f32 0.6931472, %v889_v4  ;;  %v181_v61 = vadd.f32 0.0001, %v165_v44 }
  0xd0   :  { %v893_v11 = vpop.eup %892  ;;  %912 = vlog2.f32 %v107_v0  ;;  %v199_v48 = vmul.f32 0.6931472, %v891_v8 }
  0xd1   :  { %v895_v13 = vpop.eup %894  ;;  %914 = vlog2.f32 %v170_v2  ;;  %v201_v50 = vmul.f32 0.6931472, %v893_v11 }
  0xd2   :  { %v897_v16 = vpop.eup %896  ;;  %916 = vlog2.f32 %v171_v5  ;;  %v123_v51 = vmul.f32 0.6931472, %v895_v13  ;;  %v215_v13 = vsub.f32 %v1190_v39, %v185_v43 }
  0xd3   :  { %v899_v19 = vpop.eup %898  ;;  %918 = vlog2.f32 %v114_v9  ;;  %v125_v52 = vmul.f32 0.6931472, %v897_v16  ;;  %v223_v18 = vsub.f32 %v137_v47, %v201_v50 }
  0xd4   :  { %v901_v21 = vpop.eup %900  ;;  %920 = vlog2.f32 %v115_v12  ;;  %v187_v54 = vmul.f32 0.6931472, %v899_v19  ;;  %v214_v12 = vsub.f32 %v1187_v38, %v183_v42 }
  0xd5   :  { %v903_v23 = vpop.eup %902  ;;  %922 = vlog2.f32 %v178_v14  ;;  %v189_v55 = vmul.f32 0.6931472, %v901_v21 }
  0xd6   :  { %v905_v25 = vpop.eup %904  ;;  %924 = vlog2.f32 %v179_v17  ;;  %v139_v58 = vmul.f32 0.6931472, %v903_v23  ;;  %v222_v17 = vsub.f32 %v135_v46, %v199_v48  ;;  %v216_v19 = vsub.f32 %v123_v51, %v187_v54 }
  0xd7   :  { %v907_v27 = vpop.eup %906  ;;  %926 = vlog2.f32 %v108_v20  ;;  %v141_v59 = vmul.f32 0.6931472, %v905_v25  ;;  %v217_v20 = vsub.f32 %v125_v52, %v189_v55 }
  0xd8   :  { %v909_v28 = vpop.eup %908  ;;  %928 = vlog2.f32 %v109_v22  ;;  %v203_v62 = vmul.f32 0.6931472, %v907_v27 }
  0xd9   :  { %v911_v30 = vpop.eup %910  ;;  %930 = vlog2.f32 %v172_v24  ;;  %v205_v63 = vmul.f32 0.6931472, %v909_v28 }
  0xda   :  { %v913_v33 = vpop.eup %912  ;;  %932 = vlog2.f32 %v173_v26  ;;  %v1192_v0 = vmul.f32 0.6931472, %v911_v30  ;;  %v224_v21 = vsub.f32 %v139_v58, %v203_v62 }
  0xdb   :  { %v915_v35 = vpop.eup %914  ;;  %934 = vlog2.f32 %v116_v32  ;;  %v1194_v2 = vmul.f32 0.6931472, %v913_v33  ;;  %v225_v22 = vsub.f32 %v141_v59, %v205_v63 }
  0xdc   :  { %v917_v36 = vpop.eup %916  ;;  %936 = vlog2.f32 %v117_v34  ;;  %v1196_v3 = vmul.f32 0.6931472, %v915_v35 }
  0xdd   :  { %v919_v37 = vpop.eup %918  ;;  %v1198_v4 = vmul.f32 0.6931472, %v917_v36  ;;  %938 = vlog2.f32 %v180_v56 }
  0xde   :  { %v921_v41 = vpop.eup %920  ;;  %v1200_v5 = vmul.f32 0.6931472, %v919_v37  ;;  %v218_v23 = vsub.f32 %v1192_v0, %v1196_v3  ;;  %940 = vlog2.f32 %v181_v61 }
  0xdf   :  { %v923_v45 = vpop.eup %922  ;;  %v1202_v6 = vmul.f32 0.6931472, %v921_v41  ;;  %v219_v24 = vsub.f32 %v1194_v2, %v1198_v4 }
  0xe0   :  { %v925_v49 = vpop.eup %924  ;;  %v1204_v7 = vmul.f32 0.6931472, %v923_v45 }
  0xe1   :  { %v927_v53 = vpop.eup %926  ;;  %v1206_v8 = vmul.f32 0.6931472, %v925_v49 }
  0xe2   :  { %v929_v57 = vpop.eup %928  ;;  %v1208_v9 = vmul.f32 0.6931472, %v927_v53  ;;  %v226_v25 = vsub.f32 %v1200_v5, %v1204_v7 }
  0xe3   :  { %v931_v60 = vpop.eup %930  ;;  %v1214_v14 = vmul.f32 0.6931472, %v929_v57  ;;  %v227_v26 = vsub.f32 %v1202_v6, %v1206_v8 }
  0xe4   :  { %v933_v1 = vpop.eup %932  ;;  %v1210_v10 = vmul.f32 0.6931472, %v931_v60 }
  0xe5   :  { %v935_v11 = vpop.eup %934  ;;  %v1216_v15 = vmul.f32 0.6931472, %v933_v1 }
  0xe6   :  { %v937_v16 = vpop.eup %936  ;;  %v220_v27 = vsub.f32 %v1208_v9, %v1210_v10  ;;  %v1232_v30 = vmul.f32 0.6931472, %v935_v11 }
  0xe7   :  { %v221_v29 = vsub.f32 %v1214_v14, %v1216_v15  ;;  %v1234_v31 = vmul.f32 0.6931472, %v937_v16  ;;  %v939_v48 = vpop.eup %938 }
  0xe8   :  { %v941_v60 = vpop.eup %940  ;;  %v211_v1 = vmul.f32 0.6931472, %v939_v48 }
  0xf8   :  { %s847_s8 = spop %846 }
  0xfb   :  { %s849_s9 = spop %848 }
  0xfc   :  { %s82_s10 = ssub.f32 %s847_s8, %s849_s9  ;;  %s851_s11 = spop %850 }
  0xfe   :  { %v1228_v28 = vstv %s82_s10 }
  0xff   :  { %v231_v32 = vadd.f32 %v1228_v28, %v214_v12  ;;  %v232_v33 = vadd.f32 %v1228_v28, %v215_v13  ;;  %v239_v34 = vadd.f32 %v1228_v28, %v222_v17  ;;  %v240_v35 = vadd.f32 %v1228_v28, %v223_v18 }
 0x100   :  { %v233_v36 = vadd.f32 %v1228_v28, %v216_v19  ;;  %v234_v37 = vadd.f32 %v1228_v28, %v217_v20  ;;  %v241_v38 = vadd.f32 %v1228_v28, %v224_v21  ;;  %v242_v39 = vadd.f32 %v1228_v28, %v225_v22 }
 0x101   :  { %v247_v40 = vmul.f32 10.0, %v231_v32  ;;  %v248_v41 = vmul.f32 10.0, %v232_v33  ;;  %v255_v42 = vmul.f32 10.0, %v239_v34  ;;  %v256_v43 = vmul.f32 10.0, %v240_v35 }
 0x102   :  { %v249_v44 = vmul.f32 10.0, %v233_v36  ;;  %v250_v45 = vmul.f32 10.0, %v234_v37  ;;  %v257_v46 = vmul.f32 10.0, %v241_v38  ;;  %v258_v47 = vmul.f32 10.0, %v242_v39 }
 0x103   :  { %v263_v49 = vsub.f32 0.0, %v247_v40  ;;  %v264_v50 = vsub.f32 0.0, %v248_v41  ;;  %v271_v51 = vsub.f32 0.0, %v255_v42  ;;  %v272_v52 = vsub.f32 0.0, %v256_v43 }
 0x104   :  { %v265_v53 = vsub.f32 0.0, %v249_v44  ;;  %v266_v54 = vsub.f32 0.0, %v250_v45  ;;  %v273_v55 = vsub.f32 0.0, %v257_v46  ;;  %v274_v56 = vsub.f32 0.0, %v258_v47 }
 0x105   :  { %v279_v57 = vmul.f32 1.442695, %v263_v49  ;;  %v281_v58 = vmul.f32 1.442695, %v264_v50  ;;  %v295_v59 = vmul.f32 1.442695, %v271_v51  ;;  %v235_v61 = vadd.f32 %v1228_v28, %v218_v23 }
 0x106   :  { %v297_v62 = vmul.f32 1.442695, %v272_v52  ;;  %v283_v63 = vmul.f32 1.442695, %v265_v53  ;;  %v236_v0 = vadd.f32 %v1228_v28, %v219_v24  ;;  %v285_v2 = vmul.f32 1.442695, %v266_v54 }
 0x107   :  { %942 = vpow2.f32 %v279_v57  ;;  %v299_v3 = vmul.f32 1.442695, %v273_v55  ;;  %v251_v4 = vmul.f32 10.0, %v235_v61  ;;  %v243_v6 = vadd.f32 %v1228_v28, %v226_v25 }
 0x108   :  { %944 = vpow2.f32 %v281_v58  ;;  %v252_v5 = vmul.f32 10.0, %v236_v0  ;;  %v244_v7 = vadd.f32 %v1228_v28, %v227_v26  ;;  %v301_v8 = vmul.f32 1.442695, %v274_v56 }
 0x109   :  { %946 = vpow2.f32 %v295_v59  ;;  %v267_v9 = vsub.f32 0.0, %v251_v4  ;;  %v237_v10 = vadd.f32 %v1228_v28, %v220_v27  ;;  %v259_v12 = vmul.f32 10.0, %v243_v6 }
 0x10a   :  { %948 = vpow2.f32 %v297_v62  ;;  %v268_v11 = vsub.f32 0.0, %v252_v5  ;;  %v260_v13 = vmul.f32 10.0, %v244_v7  ;;  %v213_v18 = vmul.f32 0.6931472, %v941_v60  ;;  %v392_v5 = vld [vmem:[#allocation3] sm:$0xff] }
 0x10b   :  { %950 = vpow2.f32 %v283_v63  ;;  %v287_v16 = vmul.f32 1.442695, %v267_v9  ;;  %v253_v17 = vmul.f32 10.0, %v237_v10  ;;  %v275_v20 = vsub.f32 0.0, %v259_v12 }
 0x10c   :  { %952 = vpow2.f32 %v285_v2  ;;  %v289_v19 = vmul.f32 1.442695, %v268_v11  ;;  %v276_v21 = vsub.f32 0.0, %v260_v13  ;;  %v228_v25 = vsub.f32 %v1232_v30, %v211_v1 }
 0x10d   :  { %954 = vpow2.f32 %v299_v3  ;;  %v269_v22 = vsub.f32 0.0, %v253_v17  ;;  %v303_v23 = vmul.f32 1.442695, %v275_v20  ;;  %v229_v27 = vsub.f32 %v1234_v31, %v213_v18  ;;  %v401_v20 = vld [vmem:[#allocation3 + $0x48] sm:$0xff] }
 0x10e   :  { %956 = vpow2.f32 %v301_v8  ;;  %v305_v24 = vmul.f32 1.442695, %v276_v21  ;;  %v238_v32 = vadd.f32 %v1228_v28, %v221_v29  ;;  %v245_v36 = vadd.f32 %v1228_v28, %v228_v25  ;;  %v393_v8 = vld [vmem:[#allocation3 + $0x8] sm:$0xff] }
 0x10f   :  { %958 = vpow2.f32 %v287_v16  ;;  %v291_v26 = vmul.f32 1.442695, %v269_v22  ;;  %v246_v30 = vadd.f32 %v1228_v28, %v229_v27  ;;  %v1257_v3 = vstv %s851_s11  ;;  %v400_v16 = vld [vmem:[#allocation3 + $0x40] sm:$0xff] }
 0x110   :  { %960 = vpow2.f32 %v289_v19  ;;  %v254_v40 = vmul.f32 10.0, %v238_v32  ;;  %v261_v42 = vmul.f32 10.0, %v245_v36 }
 0x111   :  { %v943_v33 = vpop.eup %942  ;;  %962 = vpow2.f32 %v303_v23  ;;  %v262_v45 = vmul.f32 10.0, %v246_v30 }
 0x112   :  { %v945_v34 = vpop.eup %944  ;;  %v311_v35 = vadd.f32 1.0, %v943_v33  ;;  %964 = vpow2.f32 %v305_v24  ;;  %v270_v48 = vsub.f32 0.0, %v254_v40  ;;  %v277_v52 = vsub.f32 0.0, %v261_v42 }
 0x113   :  { %v947_v37 = vpop.eup %946  ;;  %v312_v38 = vadd.f32 1.0, %v945_v34  ;;  %966 = vpow2.f32 %v291_v26  ;;  %v278_v55 = vsub.f32 0.0, %v262_v45  ;;  %v394_v26 = vld [vmem:[#allocation3 + $0x10] sm:$0xff]  ;;  %v395_v34 = vld [vmem:[#allocation3 + $0x18] sm:$0xff] }
 0x114   :  { %v949_v39 = vpop.eup %948  ;;  %968 = vrcp.f32 %v311_v35  ;;  %v319_v31 = vadd.f32 1.0, %v947_v37  ;;  %v293_v58 = vmul.f32 1.442695, %v270_v48  ;;  %v307_v62 = vmul.f32 1.442695, %v277_v52 }
 0x115   :  { %v951_v41 = vpop.eup %950  ;;  %970 = vrcp.f32 %v312_v38  ;;  %v320_v14 = vadd.f32 1.0, %v949_v39  ;;  %v309_v1 = vmul.f32 1.442695, %v278_v55 }
 0x116   :  { %v953_v15 = vpop.eup %952  ;;  %972 = vrcp.f32 %v319_v31  ;;  %v313_v29 = vadd.f32 1.0, %v951_v41  ;;  %v402_v31 = vld [vmem:[#allocation3 + $0x50] sm:$0xff] }
 0x117   :  { %v955_v43 = vpop.eup %954  ;;  %974 = vrcp.f32 %v320_v14  ;;  %v314_v44 = vadd.f32 1.0, %v953_v15  ;;  %v403_v15 = vld [vmem:[#allocation3 + $0x58] sm:$0xff] }
 0x118   :  { %v957_v46 = vpop.eup %956  ;;  %976 = vrcp.f32 %v313_v29  ;;  %v321_v47 = vadd.f32 1.0, %v955_v43 }
 0x119   :  { %v959_v28 = vpop.eup %958  ;;  %978 = vrcp.f32 %v314_v44  ;;  %v322_v49 = vadd.f32 1.0, %v957_v46 }
 0x11a   :  { %v961_v50 = vpop.eup %960  ;;  %980 = vrcp.f32 %v321_v47  ;;  %v315_v51 = vadd.f32 1.0, %v959_v28  ;;  %v396_v47 = vld [vmem:[#allocation3 + $0x20] sm:$0xff] }
 0x11b   :  { %v963_v53 = vpop.eup %962  ;;  %982 = vrcp.f32 %v322_v49  ;;  %v316_v54 = vadd.f32 1.0, %v961_v50  ;;  %v397_v50 = vld [vmem:[#allocation3 + $0x28] sm:$0xff] }
 0x11c   :  { %v965_v56 = vpop.eup %964  ;;  %984 = vrcp.f32 %v315_v51  ;;  %v323_v57 = vadd.f32 1.0, %v963_v53 }
 0x11d   :  { %v967_v59 = vpop.eup %966  ;;  %986 = vrcp.f32 %v316_v54  ;;  %v324_v61 = vadd.f32 1.0, %v965_v56 }
 0x11e   :  { %v969_v60 = vpop.eup %968  ;;  %988 = vrcp.f32 %v323_v57  ;;  %v317_v10 = vadd.f32 1.0, %v967_v59  ;;  %v404_v57 = vld [vmem:[#allocation3 + $0x60] sm:$0xff] }
 0x11f   :  { %v971_v63 = vpop.eup %970  ;;  %v359_v0 = vsub.f32 1.0, %v969_v60  ;;  %990 = vrcp.f32 %v324_v61  ;;  %v405_v61 = vld [vmem:[#allocation3 + $0x68] sm:$0xff] }
 0x120   :  { %v973_v2 = vpop.eup %972  ;;  %v360_v4 = vsub.f32 1.0, %v971_v63  ;;  %992 = vpow2.f32 %v293_v58 }
 0x121   :  { %v975_v6 = vpop.eup %974  ;;  %v376_v7 = vmul.f32 %v1257_v3, %v359_v0  ;;  %v367_v9 = vsub.f32 1.0, %v973_v2  ;;  %994 = vpow2.f32 %v307_v62 }
 0x122   :  { %v977_v11 = vpop.eup %976  ;;  %v377_v12 = vmul.f32 %v1257_v3, %v360_v4  ;;  %v368_v13 = vsub.f32 1.0, %v975_v6  ;;  %996 = vpow2.f32 %v309_v1 }
 0x123   :  { %v979_v17 = vpop.eup %978  ;;  %v408_v18 = vmul.f32 %v392_v5, %v376_v7  ;;  %v384_v19 = vmul.f32 %v1257_v3, %v367_v9  ;;  %v361_v21 = vsub.f32 1.0, %v977_v11  ;;  %998 = vrcp.f32 %v317_v10 }
 0x124   :  { %v981_v22 = vpop.eup %980  ;;  %v409_v23 = vmul.f32 %v393_v8, %v377_v12  ;;  %v385_v24 = vmul.f32 %v1257_v3, %v368_v13  ;;  %v362_v25 = vsub.f32 1.0, %v979_v17 }
 0x125   :  { %v983_v27 = vpop.eup %982  ;;  %v416_v32 = vmul.f32 %v400_v16, %v384_v19  ;;  %v378_v33 = vmul.f32 %v1257_v3, %v361_v21  ;;  %v369_v35 = vsub.f32 1.0, %v981_v22  ;;  %v398_v16 = vld [vmem:[#allocation3 + $0x30] sm:$0xff]  ;;  %v399_v19 = vld [vmem:[#allocation3 + $0x38] sm:$0xff] }
 0x126   :  { %v985_v36 = vpop.eup %984  ;;  %v424_v37 = vpack.c.bf16 %v409_v23, %v408_v18  ;;  %v417_v38 = vmul.f32 %v401_v20, %v385_v24  ;;  %v379_v30 = vmul.f32 %v1257_v3, %v362_v25  ;;  %v370_v39 = vsub.f32 1.0, %v983_v27  ;;  %v406_v25 = vld [vmem:[#allocation3 + $0x70] sm:$0xff] }
 0x127   :  { %v987_v40 = vpop.eup %986  ;;  %v410_v41 = vmul.f32 %v394_v26, %v378_v33  ;;  %v386_v14 = vmul.f32 %v1257_v3, %v369_v35  ;;  %v363_v29 = vsub.f32 1.0, %v985_v36 }
 0x128   :  { %v989_v42 = vpop.eup %988  ;;  %810 = vmatprep.mubr.bf16.mxu0 %v424_v37  ;;  %v428_v43 = vpack.c.bf16 %v417_v38, %v416_v32  ;;  %v411_v44 = vmul.f32 %v395_v34, %v379_v30  ;;  %v387_v45 = vmul.f32 %v1257_v3, %v370_v39  ;;  %v364_v46 = vsub.f32 1.0, %v987_v40  ;;  %v407_v32 = vld [vmem:[#allocation3 + $0x78] sm:$0xff] }
 0x129   :  { %v991_v48 = vpop.eup %990  ;;  %v418_v28 = vmul.f32 %v402_v31, %v386_v14  ;;  %v380_v49 = vmul.f32 %v1257_v3, %v363_v29  ;;  %v371_v51 = vsub.f32 1.0, %v989_v42 }
 0x12a   :  { %v993_v52 = vpop.eup %992  ;;  %818 = vmatprep.mubr.bf16.mxu1 %v428_v43  ;;  %v425_v53 = vpack.c.bf16 %v411_v44, %v410_v41  ;;  %v419_v54 = vmul.f32 %v403_v15, %v387_v45  ;;  %v381_v55 = vmul.f32 %v1257_v3, %v364_v46  ;;  %v372_v56 = vsub.f32 1.0, %v991_v48 }
 0x12b   :  { %v412_v58 = vmul.f32 %v396_v47, %v380_v49  ;;  %v388_v59 = vmul.f32 %v1257_v3, %v371_v51  ;;  %v318_v60 = vadd.f32 1.0, %v993_v52  ;;  %v995_v62 = vpop.eup %994 }
 0x12c   :  { %811 = vmatmul.mubr.bf16.vlgmr.msra.gmra.mrb[0].mxu0 %v425_v53  ;;  %v429_v63 = vpack.c.bf16 %v419_v54, %v418_v28  ;;  %v413_v0 = vmul.f32 %v397_v50, %v381_v55  ;;  %v389_v1 = vmul.f32 %v1257_v3, %v372_v56  ;;  %v997_v2 = vpop.eup %996  ;;  %v325_v5 = vadd.f32 1.0, %v995_v62 }
 0x12d   :  { %v420_v4 = vmul.f32 %v404_v57, %v388_v59  ;;  %1000 = vrcp.f32 %v318_v60  ;;  %v326_v8 = vadd.f32 1.0, %v997_v2  ;;  %v999_v9 = vpop.eup %998 }
 0x12e   :  { %819 = vmatmul.mubr.bf16.vlgmr.msra.gmra.mrb[0].mxu1 %v429_v63  ;;  %v426_v6 = vpack.c.bf16 %v413_v0, %v412_v58  ;;  %v421_v7 = vmul.f32 %v405_v61, %v389_v1  ;;  %1002 = vrcp.f32 %v325_v5  ;;  %v365_v11 = vsub.f32 1.0, %v999_v9 }
 0x12f   :  { %1004 = vrcp.f32 %v326_v8 }
 0x130   :  { %814 = vmatprep.mubr.bf16.mxu0 %v426_v6  ;;  %v430_v10 = vpack.c.bf16 %v421_v7, %v420_v4  ;;  %v382_v12 = vmul.f32 %v1257_v3, %v365_v11 }
 0x132   :  { %822 = vmatprep.mubr.bf16.mxu1 %v430_v10  ;;  %v414_v22 = vmul.f32 %v398_v16, %v382_v12 }
 0x137   :  { %v1001_v13 = vpop.eup %1000 }
 0x138   :  { %v366_v17 = vsub.f32 1.0, %v1001_v13  ;;  %v1003_v18 = vpop.eup %1002 }
 0x139   :  { %v1005_v20 = vpop.eup %1004  ;;  %v373_v23 = vsub.f32 1.0, %v1003_v18 }
 0x13a   :  { %v383_v21 = vmul.f32 %v1257_v3, %v366_v17  ;;  %v374_v24 = vsub.f32 1.0, %v1005_v20 }
 0x13b   :  { %v390_v27 = vmul.f32 %v1257_v3, %v373_v23 }
 0x13c   :  { %v415_v26 = vmul.f32 %v399_v19, %v383_v21  ;;  %v391_v33 = vmul.f32 %v1257_v3, %v374_v24 }
 0x13d   :  { %v422_v35 = vmul.f32 %v406_v25, %v390_v27 }
 0x13e   :  { %v427_v34 = vpack.c.bf16 %v415_v26, %v414_v22  ;;  %v423_v36 = vmul.f32 %v407_v32, %v391_v33 }
 0x140   :  { %815 = vmatmul.mubr.bf16.gmra.mrb[4].mxu0 %v427_v34  ;;  %v431_v37 = vpack.c.bf16 %v423_v36, %v422_v35 }
 0x142   :  { %823 = vmatmul.mubr.bf16.gmra.mrb[4].mxu1 %v431_v37 }
 0x1ff   :  { %v812_v38 = vpop.f32.mrb[0].mxu0 }
 0x200   :  { %v530_v30 = vpop.f32.mrb[1].mxu0 }
 0x201   :  { %v820_v39 = vpop.f32.mrb[0].mxu1  ;;  %v813_v31 = vpop.f32.mrb[2].mxu0 }
 0x202   :  { %v562_v40 = vpop.f32.mrb[1].mxu1  ;;  %v739_v41 = vpack.c.bf16 %v813_v31, %v812_v38  ;;  %v533_v14 = vpop.f32.mrb[3].mxu0 }
 0x203   :  { %v821_v15 = vpop.f32.mrb[2].mxu1  ;;  %v734_v29 = vpack.c.bf16 %v533_v14, %v530_v30 }
 0x204   :  { %771 = vst [vmem:[#allocation9 + $0x8] sm:$0xff] %v739_v41   ;;  %v759_v42 = vpack.c.bf16 %v821_v15, %v820_v39  ;;  %v565_v43 = vpop.f32.mrb[3].mxu1 }
 0x205   :  { %735 = vst [vmem:[#allocation9] sm:$0xff] %v734_v29   ;;  %v754_v3 = vpack.c.bf16 %v565_v43, %v562_v40 }
 0x206   :  { %775 = vst [vmem:[#allocation9 + $0x28] sm:$0xff] %v759_v42  }
 0x207   :  { %774 = vst [vmem:[#allocation9 + $0x20] sm:$0xff] %v754_v3  }
 0x213   :  { %v816_v44 = vpop.f32.mrb[4].mxu0 }
 0x214   :  { %v546_v45 = vpop.f32.mrb[5].mxu0 }
 0x215   :  { %v817_v46 = vpop.f32.mrb[6].mxu0  ;;  %v824_v47 = vpop.f32.mrb[4].mxu1 }
 0x216   :  { %v749_v48 = vpack.c.bf16 %v817_v46, %v816_v44  ;;  %v549_v28 = vpop.f32.mrb[7].mxu0  ;;  %v578_v49 = vpop.f32.mrb[5].mxu1 }
 0x217   :  { %v744_v50 = vpack.c.bf16 %v549_v28, %v546_v45  ;;  %v825_v51 = vpop.f32.mrb[6].mxu1 }
 0x218   :  { %773 = vst [vmem:[#allocation9 + $0x18] sm:$0xff] %v749_v48   ;;  %v769_v52 = vpack.c.bf16 %v825_v51, %v824_v47  ;;  %v581_v53 = vpop.f32.mrb[7].mxu1 }
 0x219   :  { %772 = vst [vmem:[#allocation9 + $0x10] sm:$0xff] %v744_v50   ;;  %v764_v54 = vpack.c.bf16 %v581_v53, %v578_v49 }
 0x21a   :  { %777 = vst [vmem:[#allocation9 + $0x38] sm:$0xff] %v769_v52  }
 0x21b   :  { %776 = vst [vmem:[#allocation9 + $0x30] sm:$0xff] %v764_v54  }
 0x21c   :  { %1083 = shalt.err (!%p1080_p0)
}
 0x21d   :  { %s1084_s16 = scalar_lea.hbm %s1294_s4, 1024 }
 0x21e   :  { %p1085_p1 = scmp.ne.s32.totalorder %s1294_s4, %s1084_s16  ;;  %p1088_p2 = scmp.lt.u32.totalorder %s1084_s16, %s1294_s4 }
 0x220   :  { %p1090_p3 = pnand %p1088_p2, %p1085_p1 }
 0x222   :  { %1093 = shalt.err (!%p1090_p3)
}
 0x223   :  { %684 = dma.vmem_to_hbm [thread:$0]  %s679_s2, 1024, %s1294_s4, [#allocation5], %s1105_s1, %s1105_s1, %s1106_s18  }
 0x224   :  { %1098 = dma.done.wait [#allocation5], 1024  }
 0x225   :  { %1099 = vsyncadd [#allocation5], 4294966272 }
 0x226   :  { %688 = vsyncpa [#allocation4], 1 }
 0x227   :  { %689 = vsyncpa [#allocation7], 1 }
 0x228   :  { %690 = vsyncpa [#allocation5], 1 }

</bundles_post_ra>
